<compile_context>
chip_gen: v7x
topology: tpu7x:2x2x1
jax: 0.10.0
libtpu: 0.0.40
codegen_flags: <defaults>
</compile_context>

<pallas_src>
import jax
import jax.numpy as jnp
from jax.experimental import pallas as pl
from jax.experimental.pallas import tpu as pltpu


def pos_emb_kernel(pos_ref, inv_ref, o_ref):
    half = inv_ref.shape[-1]                       # static Python int (block shape)
    # Compute in f32 regardless of I/O dtype; cast only at the store.
    pos = pos_ref[...].astype(jnp.float32)         # (tm, 1)
    inv = inv_ref[...].astype(jnp.float32)         # (1, half)
    if half % 128 == 0:
        # Two lane-aligned, unmasked (tm, half) stores.  Recompute the angle
        # per store so the live block stays small (no vreg spills at big tm).
        o_ref[:, :half] = jnp.sin(pos * inv).astype(o_ref.dtype)
        o_ref[:, half:] = jnp.cos(pos * inv).astype(o_ref.dtype)
    else:
        # General demb: single full-width store (lane-dense if demb % 128 == 0)
        # instead of a masked store at an unaligned lane offset.
        ang = pos * inv
        o_ref[...] = jnp.concatenate(
            [jnp.sin(ang), jnp.cos(ang)], axis=-1).astype(o_ref.dtype)


def positional_embedding(pos_seq, inv_freq, bsz=None, *, tm=None, out_dtype=None):
    """pos_seq: (L,) float; inv_freq: (demb//2,) float.
    Returns (L, 1, demb) or (L, bsz, demb), matching the PyTorch module."""
    L = pos_seq.shape[0]
    half = inv_freq.shape[0]
    demb = 2 * half

    if out_dtype is None:
        out_dtype = jnp.result_type(pos_seq.dtype, inv_freq.dtype)
    out_dtype = jnp.dtype(out_dtype)
    # sublane quantum: 8 for 32-bit output, 16 for packed sub-32-bit (bf16)
    q = 16 if out_dtype.itemsize < 4 else 8

    # Tile selection: the kernel is launch-overhead / HBM-writeback bound, so
    # default to a large row tile; for short L, split into >=2 grid steps so a
    # 2-TensorCore chip (v7x) shards the "parallel" row axis.
    if tm is None:
        tm = 1024
        if L <= tm:
            tm = max(q, (((L + 1) // 2) + q - 1) // q * q)
    n_tiles = pl.cdiv(L, tm)

    pos2 = pos_seq.reshape(L, 1)
    inv2 = inv_freq.reshape(1, half)

    # Explicit VMEM budget: double-buffered pos/out tiles + tiny inv_freq
    # block, with headroom (nowhere near any generation's limit).
    vmem_bytes = int(1.5 * (2 * tm * 1 * 4
                            + 2 * half * 4
                            + 2 * tm * demb * out_dtype.itemsize))
    vmem_bytes = max(vmem_bytes + (1 << 20), 4 << 20)

    pos_emb = pl.pallas_call(
        pos_emb_kernel,
        out_shape=jax.ShapeDtypeStruct((L, demb), out_dtype),
        grid_spec=pltpu.PrefetchScalarGridSpec(
            num_scalar_prefetch=0,
            grid=(n_tiles,),
            in_specs=[
                pl.BlockSpec((tm, 1), lambda i: (i, 0)),     # position row tile
                pl.BlockSpec((1, half), lambda i: (0, 0)),   # inv_freq (constant)
            ],
            out_specs=pl.BlockSpec((tm, demb), lambda i: (i, 0)),
        ),
        compiler_params=pltpu.CompilerParams(
            dimension_semantics=("parallel",),   # rows independent -> 2-TC shard
            vmem_limit_bytes=vmem_bytes,
        ),
    )(pos2, inv2)

    # torch.expand is a view; keep the broadcast lazy/fused in the consumer.
    if bsz is not None:
        return jnp.broadcast_to(pos_emb[:, None, :], (L, bsz, demb))
    return pos_emb[:, None, :]


def make_inv_freq(demb, dtype=jnp.float32):
    # inv_freq = 1 / 10000 ** (arange(0, demb, 2) / demb)
    return 1.0 / (10000.0 ** (jnp.arange(0.0, demb, 2.0, dtype=dtype) / demb))


def _ref(pos_seq, inv_freq):
    sinusoid = pos_seq[:, None] * inv_freq[None, :]
    return jnp.concatenate([jnp.sin(sinusoid), jnp.cos(sinusoid)], axis=-1)


if __name__ == "__main__":
    key = jax.random.PRNGKey(0)

    # --- case 1: small L, demb multiple of 256 (lane-aligned half-stores) ---
    demb, seq_len, bsz = 256, 48, 2
    pos_seq = jax.random.uniform(key, (seq_len,), jnp.float32, 0.0, float(seq_len))
    inv_freq = make_inv_freq(demb)

    out = jax.block_until_ready(positional_embedding(pos_seq, inv_freq, bsz=bsz))
    ref = _ref(pos_seq, inv_freq)
    assert out.shape == (seq_len, bsz, demb)
    assert jnp.allclose(out, jnp.broadcast_to(ref[:, None, :], out.shape),
                        atol=1e-4, rtol=1e-5)

    # bsz=None path
    out_nb = jax.block_until_ready(positional_embedding(pos_seq, inv_freq))
    assert out_nb.shape == (seq_len, 1, demb)
    assert jnp.allclose(out_nb[:, 0, :], ref, atol=1e-4, rtol=1e-5)

    # --- case 2: ragged last block (tm does not divide L) ---
    seq2 = 200
    pos2 = jnp.arange(seq2, dtype=jnp.float32)
    out2 = jax.block_until_ready(positional_embedding(pos2, inv_freq))
    assert out2.shape == (seq2, 1, demb)
    assert jnp.allclose(out2[:, 0, :], _ref(pos2, inv_freq), atol=1e-4, rtol=1e-5)

    # --- case 3: bf16 output (halved writeback), f32 internal angle ---
    out_bf = jax.block_until_ready(
        positional_embedding(pos2, inv_freq, out_dtype=jnp.bfloat16))
    assert out_bf.dtype == jnp.bfloat16
    assert jnp.allclose(out_bf[:, 0, :].astype(jnp.float32),
                        _ref(pos2, inv_freq), atol=1e-2, rtol=1e-2)

    print("KERNEL_OK")
</pallas_src>

<mosaic_0001>
module attributes {stable_mosaic.version = 11 : i64} {
  func.func @pos_emb_kernel(%arg0: i32, %arg1: memref<24x1xf32, #tpu.memory_space<vmem>>, %arg2: memref<1x128xf32, #tpu.memory_space<vmem>>, %arg3: memref<24x256xf32, #tpu.memory_space<vmem>>) attributes {dimension_semantics = [#tpu.dimension_semantics<parallel>], iteration_bounds = array<i64: 2>, scalar_prefetch = 0 : i64, scratch_operands = 0 : i64, tpu.core_type = #tpu.core_type<tc>, window_params = [{transform_indices = @transform_0, window_bounds = array<i64: 24, 1>}, {pipeline_mode = #tpu.pipeline_mode<synchronous>, transform_indices = @transform_1, window_bounds = array<i64: 1, 128>}, {transform_indices = @transform_2, window_bounds = array<i64: 24, 256>}]} {
    %c0 = arith.constant 0 : index
    %c0_0 = arith.constant 0 : index
    %0 = vector.load %arg1[%c0, %c0_0] : memref<24x1xf32, #tpu.memory_space<vmem>>, vector<24x1xf32>
    %c0_1 = arith.constant 0 : index
    %c0_2 = arith.constant 0 : index
    %1 = vector.load %arg2[%c0_1, %c0_2] : memref<1x128xf32, #tpu.memory_space<vmem>>, vector<1x128xf32>
    %2 = vector.broadcast %0 : vector<24x1xf32> to vector<24x128xf32>
    %3 = vector.broadcast %1 : vector<1x128xf32> to vector<24x128xf32>
    %4 = arith.mulf %2, %3 : vector<24x128xf32>
    %5 = math.sin %4 : vector<24x128xf32>
    %c0_3 = arith.constant 0 : index
    %c0_4 = arith.constant 0 : index
    %6 = vector.load %arg3[%c0_3, %c0_4] : memref<24x256xf32, #tpu.memory_space<vmem>>, vector<24x128xf32>
    tpu.vector_store %arg3[%c0_3, %c0_4], %5 {strides = array<i32>} : memref<24x256xf32, #tpu.memory_space<vmem>>, vector<24x128xf32>,
    %7 = vector.broadcast %0 : vector<24x1xf32> to vector<24x128xf32>
    %8 = vector.broadcast %1 : vector<1x128xf32> to vector<24x128xf32>
    %9 = arith.mulf %7, %8 : vector<24x128xf32>
    %10 = math.cos %9 : vector<24x128xf32>
    %c0_5 = arith.constant 0 : index
    %c128 = arith.constant 128 : index
    %11 = vector.load %arg3[%c0_5, %c128] : memref<24x256xf32, #tpu.memory_space<vmem>>, vector<24x128xf32>
    tpu.vector_store %arg3[%c0_5, %c128], %10 {strides = array<i32>} : memref<24x256xf32, #tpu.memory_space<vmem>>, vector<24x128xf32>,
    return
  }
  func.func @transform_0(%arg0: i32) -> (i32, i32) {
    %c0_i32 = arith.constant 0 : i32
    %c0_i32_0 = arith.constant 0 : i32
    return %arg0, %c0_i32 : i32, i32
  }
  func.func @transform_1(%arg0: i32) -> (i32, i32) {
    %c0_i32 = arith.constant 0 : i32
    %c0_i32_0 = arith.constant 0 : i32
    %c0_i32_1 = arith.constant 0 : i32
    return %c0_i32, %c0_i32_0 : i32, i32
  }
  func.func @transform_2(%arg0: i32) -> (i32, i32) {
    %c0_i32 = arith.constant 0 : i32
    %c0_i32_0 = arith.constant 0 : i32
    return %arg0, %c0_i32 : i32, i32
  }
}

</mosaic_0001>

<bundles_post_ra>
// kernel: tpu_custom_call.1
= control target key start
LH: loop header
LB: loop body
LE: loop exit
PB: predicated region body
PF: predicated region fallthrough
CT: control target
= control target key end

     0   :  { %7 = vsyncpa [#allocation3], 0  ;;  %s1377_s0 = inlined_call_operand.vmem [shape: f32[48,1], index: 0, kind: input, shape index: {}]   ;;  %s1378_s1 = inlined_call_operand.vmem [shape: f32[1,128], index: 1, kind: input, shape index: {}]   ;;  %s1379_s2 = inlined_call_operand.hbm [shape: f32[48,256], index: 2, kind: output, shape index: {}]  }
   0x1   :  { %9 = vsyncpa [#allocation3 + $0x1], 0  ;;  %s1078_s9 = smov 0   ;;  %s1080_s10 = smov 0  }
   0x2   :  { %s1082_s11 = smov 0   ;;  %s1084_s12 = smov 0  }
   0x3 LB: > { %s1099_s13 = sadd.s32 4294967295, %s1051_s12   ;;  %s877_s14 = sadd.s32 4294967294, %s1051_s12   ;;  %s1051_s12 = sphi %s1084_s12, %s1385_s12   ;;  %s1047_s11 = sphi %s1082_s11, %s1384_s11   ;;  %s1043_s10 = sphi %s1080_s10, %s1383_s10   ;;  %s1039_s9 = sphi %s1078_s9, %s1382_s9  }
   0x4   : > { %s1103_s15 = sadd.s32 1, %s1051_s12   ;;  %s69_s16 = sadd.s32 1, %s1047_s11 }
   0x5   : > { %s66_s17 = ssub.s32 %s1051_s12, %s1103_s15  ;;  %p79_p0 = scmp.ne.s32.totalorder %s1047_s11, %s1043_s10 }
   0x6   : > { %p67_p1 = scmp.eq.s32.totalorder %s66_s17, 0  ;;  %p80_p2 = scmp.eq.s32.totalorder %s1099_s13, 1 }
   0x7   : > { %p85_p3 = scmp.ne.s32.totalorder %s1043_s10, %s1039_s9  ;;  %p86_p4 = scmp.eq.s32.totalorder %s877_s14, 1 }
   0x8   : > { %s1114_s18 = scalar_select %p67_p1, %s1047_s11, %s69_s16  }
   0x9   : > { %p1116_p5 = por %p80_p2, %p79_p0  ;;  %p1120_p6 = por %p86_p4, %p85_p3 }
   0xa   : > { %p880_p7 = scmp.ge.s32.totalorder %s1051_s12, 1  ;;  %p116_p8 = scmp.lt.s32.totalorder %s1051_s12, 3 }
   0xc   : > { %p117_p9 = pnand %p880_p7, %p116_p8 }
   0xd   : > { %s138_s21 = smul.u32 (!%p117_p9), 3, %s1099_s13  ;;  %v1053_v0 = vmov (!%p117_p9), 0   ;;  %v882_v4 = vld [vmem:[%s1378_s1] ss:$0 sm:$0xff] (!%p117_p9)  ;;  %v1054_v36 = vmov (!%p117_p9), 683565275  }
   0xe   : > { %120 = sbr.rel (%p117_p9) target bundleno = 278 (0x116), region = 28  ;;  %976 = vset.pattern.permute.xlu1 (!%p117_p9), %v1053_v0  ;;  %975 = vset.pattern.permute.xlu0 (!%p117_p9), %v1053_v0  ;;  %v1055_v38 = vmov (!%p117_p9), 2475754826   ;;  %v1056_v40 = vmov (!%p117_p9), 2131351028   ;;  %s135_s28 = sand.u32 (!%p117_p9), 1, %s1043_s10  }
   0xf   : > { %p139_p10 = scmp.lt.s32.totalorder (!%p117_p9), %s138_s21, 5  ;;  %v1057_v42 = vmov (!%p117_p9), 2102212464   ;;  %v1058_v44 = vmov (!%p117_p9), 920167782   ;;  %s914_s29 = smul.u32 (!%p117_p9), 48, %s135_s28 }
  0x10   : > { %v1059_v53 = vmov (!%p117_p9), 1326507024   ;;  %s913_s3 = smul.u32 (!%p117_p9), 768, %s1099_s13  ;;  %s1336_s8 = scalar_lea.sflag (!%p117_p9), [#allocation3], %s135_s28 }
  0x11   : > { %s1306_s30 = scalar_lea.vmem (!%p117_p9), [#allocation2], %s914_s29  ;;  %s1060_s14 = smov (!%p117_p9), [#allocation2]  }
  0x12   : > { %s815_s4 = sshll.u32 (!%p117_p9), %s1306_s30, 4  ;;  %s1327_s7 = scalar_lea.hbm (!%p117_p9), %s1379_s2, %s913_s3  ;;  %s1329_s4 = int_to_ptr.vmem [resolvable:$true] %s815_s4 }
  0x13   : > { %s989_s13 = scalar_lea.vmem (!%p117_p9), %s1329_s4, 768  ;;  %s993_s16 = sshll.u32 (!%p117_p9), %s1060_s14, 4  ;;  %s994_s16 = int_to_ptr.vmem [resolvable:$false] %s993_s16 }
  0x14   : > { %p990_p11 = scmp.ne.s32.totalorder (!%p117_p9), %s1329_s4, %s989_s13  ;;  %s995_s17 = scalar_lea.vmem (!%p117_p9), %s994_s16, 1536 }
  0x15   : > { %s1387_s21 = smov (!%p139_p10, %s138_s21), 5  ;;  %p996_p0 = scmp.lt.s32.totalorder %s1329_s4, %s994_s16 }
  0x16   : > { %s881_s22 = sshll.u32 %s1387_s21, 3  ;;  %p991_p12 = pnand %p990_p11, %p1116_p5 }
  0x17   : > { %s142_s25 = scalar_lea.vmem %s1377_s0, %s881_s22  ;;  %p997_p1 = scmp.lt.s32.totalorder %s995_s17, %s989_s13 }
  0x18   : > { %v147_v1 = vld [vmem:[%s142_s25 + $0x10] sm:$0xff]  ;;  %v145_v2 = vld [vmem:[%s142_s25] sm:$0xff]  ;;  %v146_v3 = vld [vmem:[%s142_s25 + $0x8] sm:$0xff]  ;;  %p992_p13 = pneg %p991_p12 }
  0x19   : > { %161 = vperm.xlu1 %976, %v147_v1   ;;  %151 = vperm.xlu0 %975, %v145_v2   ;;  %p998_p2 = por %p997_p1, %p996_p0 }
  0x1b   : > { %p999_p3 = pnand %p998_p2, %p992_p13 }
  0x1d   : > { %156 = vperm.xlu0 %975, %v146_v3  }
  0x98   : > { %v162_v5 = vpop.permute.xlu1 %161  ;;  %v152_v6 = vpop.permute.xlu0 %151 }
  0x99   : > { %v1133_v7 = vmul.f32 %v882_v4, %v162_v5  ;;  %v1135_v8 = vmul.f32 %v882_v4, %v152_v6 }
  0x9b   : > { %v381_v9 = vand.u32 2147483647, %v1133_v7  ;;  %v384_v10 = vand.u32 2139095040, %v1133_v7  ;;  %v173_v11 = vand.u32 2147483647, %v1135_v8  ;;  %v176_v12 = vand.u32 2139095040, %v1135_v8 }
  0x9c   : > { %v157_v13 = vpop.permute.xlu0 %156 }
  0x9d   : > { %v385_v14 = vshrl.u32 %v384_v10, 23  ;;  %v1141_v15 = vmul.f32 %v882_v4, %v157_v13  ;;  %v388_v16 = vand.u32 8388607, %v381_v9  ;;  %v177_v17 = vshrl.u32 %v176_v12, 23 }
  0x9e   : > { %v180_v18 = vand.u32 8388607, %v173_v11 }
  0x9f   : > { %v891_v19 = vadd.s32 4294967169, %v385_v14  ;;  %v883_v20 = vadd.s32 4294967169, %v177_v17  ;;  %v280_v21 = vand.u32 2139095040, %v1141_v15  ;;  %v389_v23 = vor.u32 8388608, %v388_v16 }
  0xa0   : > { %v181_v24 = vor.u32 8388608, %v180_v18 }
  0xa1   : > { %v391_v22 = vadd.s32 1, %v891_v19  ;;  %v183_v25 = vadd.s32 1, %v883_v20  ;;  %v281_v26 = vshrl.u32 %v280_v21, 23  ;;  %v1148_v32 = vshll.u32 %v389_v23, 8 }
  0xa2   : > { %v1150_v34 = vshll.u32 %v181_v24, 8 }
  0xa3   : > { %vm392_vm0 = vcmp.gt.s32.totalorder %v391_v22, 0  ;;  %vm184_vm1 = vcmp.gt.s32.totalorder %v183_v25, 0  ;;  %v887_v28 = vadd.s32 4294967169, %v281_v26 }
  0xa4   : > { %v393_v27 = vsel %vm392_vm0, %v391_v22, 0  ;;  %v185_v30 = vsel %vm184_vm1, %v183_v25, 0 }
  0xa5   : > { %v395_v29 = vand.u32 31, %v393_v27  ;;  %v394_v31 = vshrl.u32 %v393_v27, 5  ;;  %v187_v33 = vand.u32 31, %v185_v30  ;;  %v1157_v46 = vshrl.u32 %v185_v30, 5 }
  0xa6   : > { %v1159_v47 = vadd.s32 1, %v887_v28 }
  0xa7   : > { %v396_v35 = vsub.s32 32, %v395_v29  ;;  %v398_v37 = vshll.u32 %v1054_v36, %v395_v29  ;;  %v401_v39 = vshll.u32 %v1055_v38, %v395_v29  ;;  %v404_v41 = vshll.u32 %v1056_v40, %v395_v29 }
  0xa8   : > { %v407_v43 = vshll.u32 %v1057_v42, %v395_v29  ;;  %v410_v45 = vshll.u32 %v1058_v44, %v395_v29  ;;  %vm413_vm2 = vcmp.lt.s32.totalorder %v394_v31, 1  ;;  %vm414_vm3 = vcmp.lt.s32.totalorder %v394_v31, 2 }
  0xa9   : > { %v397_v48 = vshrl.u32 %v1054_v36, %v396_v35  ;;  %v399_v49 = vshrl.u32 %v1055_v38, %v396_v35  ;;  %v402_v50 = vshrl.u32 %v1056_v40, %v396_v35  ;;  %v405_v51 = vshrl.u32 %v1057_v42, %v396_v35 }
  0xaa   : > { %v408_v52 = vshrl.u32 %v1058_v44, %v396_v35  ;;  %v411_v54 = vshrl.u32 %v1059_v53, %v396_v35  ;;  %v188_v58 = vsub.s32 32, %v187_v33  ;;  %vm415_vm4 = vcmp.lt.s32.totalorder %v394_v31, 3 }
  0xab   : > { %v400_v55 = vor.u32 %v399_v49, %v398_v37  ;;  %v403_v56 = vor.u32 %v402_v50, %v401_v39  ;;  %v406_v57 = vor.u32 %v405_v51, %v404_v41  ;;  %vm416_vm5 = vcmp.lt.s32.totalorder %v394_v31, 4 }
  0xac   : > { %v409_v59 = vor.u32 %v408_v52, %v407_v43  ;;  %v412_v60 = vor.u32 %v411_v54, %v410_v45  ;;  %v190_v4 = vshll.u32 %v1054_v36, %v187_v33  ;;  %v191_v10 = vshrl.u32 %v1055_v38, %v188_v58 }
  0xad   : > { %v417_v61 = vsel %vm413_vm2, %v397_v48, %v400_v55  ;;  %v418_v62 = vsel %vm416_vm5, %v406_v57, 2102212464  ;;  %v421_v63 = vsel %vm413_vm2, %v400_v55, %v403_v56  ;;  %v425_v0 = vsel %vm413_vm2, %v403_v56, %v406_v57 }
  0xae   : > { %v419_v1 = vsel %vm415_vm4, %v403_v56, %v418_v62  ;;  %v422_v2 = vsel %vm416_vm5, %v409_v59, 920167782  ;;  %v426_v3 = vsel %vm416_vm5, %v412_v60, 1326507024  ;;  %v193_v12 = vshll.u32 %v1055_v38, %v187_v33 }
  0xaf   : > { %v423_v5 = vsel %vm415_vm4, %v406_v57, %v422_v2  ;;  %v427_v6 = vsel %vm415_vm4, %v409_v59, %v426_v3  ;;  %v420_v13 = vsel %vm414_vm3, %v417_v61, %v419_v1  ;;  %v194_v17 = vshrl.u32 %v1056_v40, %v188_v58 }
  0xb0   : > { %v424_v14 = vsel %vm414_vm3, %v421_v63, %v423_v5  ;;  %v428_v16 = vsel %vm414_vm3, %v425_v0, %v427_v6  ;;  %v192_v22 = vor.u32 %v191_v10, %v190_v4  ;;  %v196_v24 = vshll.u32 %v1056_v40, %v187_v33 }
  0xb1   : > { %v1175_v18 = vmul.u32.u64.low %v1148_v32, %v428_v16  ;;  %v1176_v19 = vmul.u32.u64.high %v1148_v32, %v428_v16, %v1175_v18  ;;  %v1179_v20 = vmul.u32.u64.low %v1148_v32, %v424_v14  ;;  %v1180_v21 = vmul.u32.u64.high %v1148_v32, %v424_v14, %v1179_v20 }
  0xb2   : > { %v195_v23 = vor.u32 %v194_v17, %v193_v12  ;;  %v197_v25 = vshrl.u32 %v1057_v42, %v188_v58  ;;  %v189_v26 = vshrl.u32 %v1054_v36, %v188_v58  ;;  %v199_v27 = vshll.u32 %v1057_v42, %v187_v33 }
  0xb3   : > { %v200_v28 = vshrl.u32 %v1058_v44, %v188_v58  ;;  %v203_v29 = vshrl.u32 %v1059_v53, %v188_v58  ;;  %v436_v30 = vmul.u32 %v1148_v32, %v420_v13  ;;  %v202_v35 = vshll.u32 %v1058_v44, %v187_v33 }
  0xb4   : > { %v198_v31 = vor.u32 %v197_v25, %v196_v24  ;;  %vm205_vm6 = vcmp.lt.s32.totalorder %v1157_v46, 1  ;;  %vm438_vm7 = vc.u32 %v1176_v19, %v1179_v20  ;;  %v439_v37 = vadd.s32 1, %v1180_v21 }
  0xb5   : > { %v201_v39 = vor.u32 %v200_v28, %v199_v27  ;;  %vm206_vm8 = vcmp.lt.s32.totalorder %v1157_v46, 2  ;;  %v204_v41 = vor.u32 %v203_v29, %v202_v35  ;;  %vm207_vm9 = vcmp.lt.s32.totalorder %v1157_v46, 3 }
  0xb6   : > { %vm208_vm10 = vcmp.lt.s32.totalorder %v1157_v46, 4  ;;  %v213_v43 = vsel %vm205_vm6, %v192_v22, %v195_v23  ;;  %v440_v32 = vsel %vm438_vm7, %v439_v37, %v1180_v21  ;;  %v217_v33 = vsel %vm205_vm6, %v195_v23, %v198_v31 }
  0xb7   : > { %v210_v45 = vsel %vm208_vm10, %v198_v31, 2102212464  ;;  %v214_v48 = vsel %vm208_vm10, %v201_v39, 920167782  ;;  %v441_v49 = vadd.s32 %v440_v32, %v436_v30  ;;  %v209_v50 = vsel %vm205_vm6, %v189_v26, %v192_v22 }
  0xb8   : > { %v215_v51 = vsel %vm207_vm9, %v198_v31, %v214_v48  ;;  %v218_v52 = vsel %vm208_vm10, %v204_v41, 1326507024  ;;  %v211_v54 = vsel %vm207_vm9, %v195_v23, %v210_v45  ;;  %vm288_vm11 = vcmp.gt.s32.totalorder %v1159_v47, 0 }
  0xb9   : > { %v216_v55 = vsel %vm206_vm8, %v213_v43, %v215_v51  ;;  %v219_v56 = vsel %vm207_vm9, %v201_v39, %v218_v52  ;;  %v442_v57 = vadd.s32 536870912, %v441_v49  ;;  %v277_v63 = vand.u32 2147483647, %v1141_v15 }
  0xba   : > { %v220_v58 = vsel %vm206_vm8, %v217_v33, %v219_v56  ;;  %v1203_v59 = vmul.u32.u64.low %v1150_v34, %v216_v55  ;;  %v1204_v60 = vmul.u32.u64.high %v1150_v34, %v216_v55, %v1203_v59  ;;  %v212_v1 = vsel %vm206_vm8, %v209_v50, %v211_v54 }
  0xbb   : > { %v1207_v61 = vmul.u32.u64.low %v1150_v34, %v220_v58  ;;  %v1208_v62 = vmul.u32.u64.high %v1150_v34, %v220_v58, %v1207_v61  ;;  %v1211_v0 = vshrl.u32 %v442_v57, 30  ;;  %v289_v2 = vsel %vm288_vm11, %v1159_v47, 0 }
  0xbc   : > { %v231_v4 = vadd.s32 1, %v1204_v60  ;;  %v228_v5 = vmul.u32 %v1150_v34, %v212_v1  ;;  %v284_v6 = vand.u32 8388607, %v277_v63  ;;  %v291_v13 = vand.u32 31, %v289_v2 }
  0xbd   : > { %v444_v3 = vshll.u32 %v1211_v0, 30  ;;  %vm230_vm12 = vc.u32 %v1208_v62, %v1203_v59  ;;  %v437_v34 = vadd.s32 %v1179_v20, %v1176_v19  ;;  %v467_v26 = vsub.s32 4, %v1211_v0 }
  0xbe   : > { %v232_v12 = vsel %vm230_vm12, %v231_v4, %v1204_v60  ;;  %v285_v17 = vor.u32 8388608, %v284_v6  ;;  %v292_v18 = vsub.s32 32, %v291_v13  ;;  %v1230_v27 = vshrl.u32 %v289_v2, 5 }
  0xbf   : > { %v445_v10 = vsub.s32 %v441_v49, %v444_v3  ;;  %v233_v14 = vadd.s32 %v232_v12, %v228_v5  ;;  %v294_v19 = vshll.u32 %v1054_v36, %v291_v13  ;;  %v297_v20 = vshll.u32 %v1055_v38, %v291_v13 }
  0xc0   : > { %v1227_v24 = vshll.u32 %v285_v17, 8  ;;  %v295_v28 = vshrl.u32 %v1055_v38, %v292_v18  ;;  %v298_v30 = vshrl.u32 %v1056_v40, %v292_v18  ;;  %v301_v31 = vshrl.u32 %v1057_v42, %v292_v18 }
  0xc1   : > { %v447_v46 = vsub.s32 0, %v445_v10  ;;  %v234_v16 = vadd.s32 536870912, %v233_v14  ;;  %v304_v35 = vshrl.u32 %v1058_v44, %v292_v18  ;;  %v307_v37 = vshrl.u32 %v1059_v53, %v292_v18 }
  0xc2   : > { %v300_v43 = vshll.u32 %v1056_v40, %v291_v13  ;;  %v303_v32 = vshll.u32 %v1057_v42, %v291_v13  ;;  %v296_v33 = vor.u32 %v295_v28, %v294_v19  ;;  %v306_v49 = vshll.u32 %v1058_v44, %v291_v13 }
  0xc3   : > { %v892_v47 = vmin.u32 %v447_v46, %v445_v10  ;;  %v1223_v21 = vshrl.u32 %v234_v16, 30  ;;  %v299_v51 = vor.u32 %v298_v30, %v297_v20  ;;  %v229_v57 = vadd.s32 %v1203_v59, %v1208_v62 }
  0xc4   : > { %v302_v52 = vor.u32 %v301_v31, %v300_v43  ;;  %v305_v54 = vor.u32 %v304_v35, %v303_v32  ;;  %v308_v56 = vor.u32 %v307_v37, %v306_v49  ;;  %v293_v40 = vshrl.u32 %v1054_v36, %v292_v18 }
  0xc5   : > { %v449_v22 = vclz %v892_v47  ;;  %v236_v23 = vshll.u32 %v1223_v21, 30  ;;  %vm309_vm14 = vcmp.lt.s32.totalorder %v1230_v27, 1  ;;  %vm311_vm15 = vcmp.lt.s32.totalorder %v1230_v27, 3 }
  0xc6   : > { %vm312_vm0 = vcmp.lt.s32.totalorder %v1230_v27, 4  ;;  %v317_v61 = vsel %vm309_vm14, %v296_v33, %v299_v51  ;;  %v321_v2 = vsel %vm309_vm14, %v299_v51, %v302_v52  ;;  %vm310_vm2 = vcmp.lt.s32.totalorder %v1230_v27, 2 }
  0xc7   : > { %v893_v25 = vadd.s32 4294967294, %v449_v22  ;;  %v1233_v29 = vsub.s32 %v233_v14, %v236_v23  ;;  %v318_v1 = vsel %vm312_vm0, %v305_v54, 920167782  ;;  %v314_v62 = vsel %vm312_vm0, %v302_v52, 2102212464 }
  0xc8   : > { %v319_v36 = vsel %vm311_vm15, %v302_v52, %v318_v1  ;;  %v322_v3 = vsel %vm312_vm0, %v308_v56, 1326507024  ;;  %v313_v16 = vsel %vm309_vm14, %v293_v40, %v296_v33  ;;  %v315_v17 = vsel %vm311_vm15, %v299_v51, %v314_v62 }
  0xc9   : > { %vm894_vm13 = vcmp.lt.s32.totalorder %v893_v25, 0  ;;  %v239_v41 = vsub.s32 0, %v1233_v29  ;;  %v323_v5 = vsel %vm311_vm15, %v305_v54, %v322_v3  ;;  %v320_v12 = vsel %vm310_vm2, %v317_v61, %v319_v36 }
  0xca   : > { %v452_v39 = vsel %vm894_vm13, 0, %v893_v25  ;;  %v324_v13 = vsel %vm310_vm2, %v321_v2, %v323_v5  ;;  %v1274_v28 = vmul.u32.u64.low %v1227_v24, %v320_v12  ;;  %v1275_v30 = vmul.u32.u64.high %v1227_v24, %v320_v12, %v1274_v28 }
  0xcb   : > { %v453_v45 = vsub.s32 32, %v452_v39  ;;  %v457_v48 = vsub.s32 4294967266, %v452_v39  ;;  %v884_v50 = vmin.u32 %v239_v41, %v1233_v29  ;;  %v454_v38 = vshll.u32 %v445_v10, %v452_v39 }
  0xcc   : > { %vm383_vm3 = vcmp.lt.s32.totalorder %v1133_v7, 0  ;;  %v316_v20 = vsel %vm310_vm2, %v313_v16, %v315_v17  ;;  %vm382_vm4 = vcmp.le.f32.partialorder %v381_v9, 0.7853982  ;;  %v335_v43 = vadd.s32 1, %v1275_v30 }
  0xcd   : > { %v455_v55 = vshrl.u32 %v437_v34, %v453_v45  ;;  %v458_v53 = vadd.s32 127, %v457_v48  ;;  %v241_v58 = vclz %v884_v50  ;;  %v468_v35 = vsel %vm383_vm3, %v467_v26, %v1211_v0 }
  0xce   : > { %v1270_v22 = vmul.u32.u64.low %v1227_v24, %v324_v13  ;;  %v1271_v34 = vmul.u32.u64.high %v1227_v24, %v324_v13, %v1270_v22  ;;  %v470_v32 = vsel %vm382_vm4, 0, %v468_v35  ;;  %v332_v0 = vmul.u32 %v1227_v24, %v316_v20 }
  0xcf   : > { %v456_v42 = vor.u32 %v455_v55, %v454_v38  ;;  %v459_v60 = vshll.u32 %v458_v53, 23  ;;  %v885_v44 = vadd.s32 4294967294, %v241_v58  ;;  %v259_v33 = vsub.s32 4, %v1223_v21 }
  0xd0   : > { %vm334_vm5 = vc.u32 %v1271_v34, %v1274_v28  ;;  %v474_v49 = vadd.s32 3, %v470_v32  ;;  %vm175_vm6 = vcmp.lt.s32.totalorder %v1135_v8, 0  ;;  %v787_v54 = vand.u32 3, %v470_v32 }
  0xd1   : > { %v460_v59 = vor.u32 4788187, %v459_v60  ;;  %v463_v4 = vcvt.s32.f32 %v456_v42  ;;  %vm886_vm1 = vcmp.lt.s32.totalorder %v885_v44, 0  ;;  %v336_v45 = vsel %vm334_vm5, %v335_v43, %v1275_v30 }
  0xd2   : > { %v244_v10 = vsel %vm886_vm1, 0, %v885_v44  ;;  %v337_v9 = vadd.s32 %v336_v45, %v332_v0  ;;  %vm174_vm7 = vcmp.le.f32.partialorder %v173_v11, 0.7853982  ;;  %v260_v38 = vsel %vm175_vm6, %v259_v33, %v1223_v21 }
  0xd3   : > { %v461_v6 = vand.u32 2147483647, %v460_v59  ;;  %v245_v14 = vsub.s32 32, %v244_v10  ;;  %v249_v46 = vsub.s32 4294967266, %v244_v10  ;;  %v246_v18 = vshll.u32 %v1233_v29, %v244_v10 }
  0xd4   : > { %v338_v50 = vadd.s32 536870912, %v337_v9  ;;  %v475_v55 = vand.u32 3, %v474_v49  ;;  %v262_v58 = vsel %vm174_vm7, 0, %v260_v38  ;;  %vm788_vm8 = vcmp.lt.s32.totalorder %v787_v54, 2 }
  0xd5   : > { %v464_v47 = vmul.f32 %v463_v4, %v461_v6  ;;  %v247_v23 = vshrl.u32 %v229_v57, %v245_v14  ;;  %v250_v25 = vadd.s32 127, %v249_v46  ;;  %vm789_vm9 = vcmp.eq.s32.totalorder %v787_v54, 0 }
  0xd6   : > { %v1294_v52 = vshrl.u32 %v338_v50, 30  ;;  %vm480_vm10 = vcmp.eq.s32.totalorder %v475_v55, 2  ;;  %vm792_vm11 = vcmp.eq.s32.totalorder %v787_v54, 2  ;;  %vm477_vm12 = vcmp.eq.s32.totalorder %v475_v55, 0 }
  0xd7   : > { %v465_v31 = vxor.u32 2147483648, %v464_v47  ;;  %v248_v19 = vor.u32 %v247_v23, %v246_v18  ;;  %v251_v29 = vshll.u32 %v250_v25, 23  ;;  %v266_v1 = vadd.s32 3, %v262_v58 }
  0xd8   : > { %v340_v56 = vshll.u32 %v1294_v52, 30  ;;  %vm476_vm13 = vcmp.lt.s32.totalorder %v475_v55, 2  ;;  %vm473_vm14 = vweird.f32 %v1133_v7  ;;  %v581_v4 = vand.u32 3, %v262_v58 }
  0xd9   : > { %v466_v37 = vsel %vm383_vm3, %v465_v31, %v464_v47  ;;  %v252_v41 = vor.u32 4788187, %v251_v29  ;;  %v255_v27 = vcvt.s32.f32 %v248_v19  ;;  %v267_v12 = vand.u32 3, %v266_v1 }
  0xda   : > { %v469_v39 = vsel %vm382_vm4, %v1133_v7, %v466_v37  ;;  %v341_v40 = vsub.s32 %v337_v9, %v340_v56  ;;  %vm582_vm15 = vcmp.lt.s32.totalorder %v581_v4, 2  ;;  %vm583_vm0 = vcmp.eq.s32.totalorder %v581_v4, 0 }
  0xdb   : > { %977 = vcosq.f32 %v469_v39  ;;  %v253_v26 = vand.u32 2147483647, %v252_v41  ;;  %vm586_vm1 = vcmp.eq.s32.totalorder %v581_v4, 2  ;;  %vm269_vm3 = vcmp.eq.s32.totalorder %v267_v12, 0 }
  0xdc   : > { %979 = vsinq.f32 %v469_v39  ;;  %v343_v21 = vsub.s32 0, %v341_v40  ;;  %vm272_vm4 = vcmp.eq.s32.totalorder %v267_v12, 2  ;;  %v333_v22 = vadd.s32 %v1274_v28, %v1271_v34 }
  0xdd   : > { %v256_v48 = vmul.f32 %v255_v27, %v253_v26  ;;  %vm268_vm5 = vcmp.lt.s32.totalorder %v267_v12, 2  ;;  %v363_v27 = vsub.s32 4, %v1294_v52 }
  0xde   : > { %v888_v62 = vmin.u32 %v343_v21, %v341_v40 }
  0xdf   : > { %v257_v51 = vxor.u32 2147483648, %v256_v48 }
  0xe0   : > { %v345_v10 = vclz %v888_v62 }
  0xe1   : > { %v258_v24 = vsel %vm175_vm6, %v257_v51, %v256_v48  ;;  %vm265_vm6 = vweird.f32 %v1135_v8 }
  0xe2   : > { %v261_v53 = vsel %vm174_vm7, %v1135_v8, %v258_v24  ;;  %v889_v13 = vadd.s32 4294967294, %v345_v10  ;;  %vm279_vm7 = vcmp.lt.s32.totalorder %v1141_v15, 0 }
  0xe3   : > { %981 = vcosq.f32 %v261_v53  ;;  %v364_v9 = vsel %vm279_vm7, %v363_v27, %v1294_v52 }
  0xe4   : > { %983 = vsinq.f32 %v261_v53  ;;  %vm890_vm2 = vcmp.lt.s32.totalorder %v889_v13, 0 }
  0xe5   : > { %v978_v57 = vpop.eup %977  ;;  %v348_v17 = vsel %vm890_vm2, 0, %v889_v13 }
  0xe6   : > { %v980_v42 = vpop.eup %979  ;;  %v481_v60 = vxor.u32 2147483648, %v978_v57  ;;  %v349_v23 = vsub.s32 32, %v348_v17  ;;  %v353_v31 = vsub.s32 4294967266, %v348_v17  ;;  %v350_v39 = vshll.u32 %v341_v40, %v348_v17 }
  0xe7   : > { %v478_v11 = vxor.u32 2147483648, %v980_v42 }
  0xe8   : > { %v482_v44 = vsel %vm480_vm10, %v481_v60, %v980_v42  ;;  %v794_v61 = vsel %vm792_vm11, %v481_v60, %v980_v42  ;;  %v351_v29 = vshrl.u32 %v333_v22, %v349_v23  ;;  %v354_v41 = vadd.s32 127, %v353_v31 }
  0xe9   : > { %v479_v2 = vsel %vm477_vm12, %v978_v57, %v478_v11  ;;  %v791_v59 = vsel %vm789_vm9, %v978_v57, %v478_v11 }
  0xea   : > { %v483_v36 = vsel %vm476_vm13, %v479_v2, %v482_v44  ;;  %v795_v3 = vsel %vm788_vm8, %v791_v59, %v794_v61  ;;  %v352_v43 = vor.u32 %v351_v29, %v350_v39  ;;  %v355_v32 = vshll.u32 %v354_v41, 23 }
  0xeb   : > { %v484_v5 = vsel %vm473_vm14, nan, %v483_v36  ;;  %v796_v6 = vsel %vm473_vm14, nan, %v795_v3  ;;  %vm278_vm8 = vcmp.le.f32.partialorder %v277_v63, 0.7853982 }
  0xec   : > { %487 = vst [vmem:[%s1306_s30 + $0x20] sm:$0xff] %v484_v5  ;;  %799 = vst [vmem:[%s1306_s30 + $0x28] sm:$0xff] %v796_v6  ;;  %v356_v34 = vor.u32 4788187, %v355_v32  ;;  %v359_v0 = vcvt.s32.f32 %v352_v43  ;;  %v366_v33 = vsel %vm278_vm8, 0, %v364_v9 }
  0xed   : > { %v982_v14 = vpop.eup %981  ;;  %v370_v49 = vadd.s32 3, %v366_v33  ;;  %v684_v51 = vand.u32 3, %v366_v33 }
  0xee   : > { %v984_v46 = vpop.eup %983  ;;  %v273_v16 = vxor.u32 2147483648, %v982_v14  ;;  %v357_v28 = vand.u32 2147483647, %v356_v34 }
  0xef   : > { %v270_v7 = vxor.u32 2147483648, %v984_v46  ;;  %v371_v50 = vand.u32 3, %v370_v49  ;;  %vm689_vm10 = vcmp.eq.s32.totalorder %v684_v51, 2  ;;  %vm686_vm12 = vcmp.eq.s32.totalorder %v684_v51, 0 }
  0xf0   : > { %v274_v47 = vsel %vm272_vm4, %v273_v16, %v984_v46  ;;  %v588_v18 = vsel %vm586_vm1, %v273_v16, %v984_v46  ;;  %v360_v26 = vmul.f32 %v359_v0, %v357_v28  ;;  %vm685_vm14 = vcmp.lt.s32.totalorder %v684_v51, 2 }
  0xf1   : > { %v271_v25 = vsel %vm269_vm3, %v982_v14, %v270_v7  ;;  %v585_v30 = vsel %vm583_vm0, %v982_v14, %v270_v7  ;;  %vm376_vm9 = vcmp.eq.s32.totalorder %v371_v50, 2  ;;  %vm373_vm11 = vcmp.eq.s32.totalorder %v371_v50, 0 }
  0xf2   : > { %v275_v35 = vsel %vm268_vm5, %v271_v25, %v274_v47  ;;  %v589_v19 = vsel %vm582_vm15, %v585_v30, %v588_v18  ;;  %v361_v8 = vxor.u32 2147483648, %v360_v26  ;;  %vm372_vm13 = vcmp.lt.s32.totalorder %v371_v50, 2 }
  0xf3   : > { %v276_v20 = vsel %vm265_vm6, nan, %v275_v35  ;;  %v590_v37 = vsel %vm265_vm6, nan, %v589_v19  ;;  %vm369_vm15 = vweird.f32 %v1141_v15 }
  0xf4   : > { %485 = vst [vmem:[%s1306_s30] sm:$0xff] %v276_v20  ;;  %797 = vst [vmem:[%s1306_s30 + $0x8] sm:$0xff] %v590_v37  ;;  %v362_v45 = vsel %vm279_vm7, %v361_v8, %v360_v26 }
  0xf5   : > { %v365_v48 = vsel %vm278_vm8, %v1141_v15, %v362_v45 }
  0xf6   : > { %985 = vcosq.f32 %v365_v48 }
  0xf7   : > { %987 = vsinq.f32 %v365_v48 }
 0x100   : > { %v986_v54 = vpop.eup %985 }
 0x101   : > { %v988_v24 = vpop.eup %987  ;;  %v377_v38 = vxor.u32 2147483648, %v986_v54 }
 0x102   : > { %v374_v55 = vxor.u32 2147483648, %v988_v24 }
 0x103   : > { %v378_v63 = vsel %vm376_vm9, %v377_v38, %v988_v24  ;;  %v691_v52 = vsel %vm689_vm10, %v377_v38, %v988_v24 }
 0x104   : > { %v375_v53 = vsel %vm373_vm11, %v986_v54, %v374_v55  ;;  %v688_v56 = vsel %vm686_vm12, %v986_v54, %v374_v55 }
 0x105   : > { %v379_v57 = vsel %vm372_vm13, %v375_v53, %v378_v63  ;;  %v692_v58 = vsel %vm685_vm14, %v688_v56, %v691_v52 }
 0x106   : > { %v380_v40 = vsel %vm369_vm15, nan, %v379_v57  ;;  %v693_v42 = vsel %vm369_vm15, nan, %v692_v58 }
 0x107   : > { %486 = vst [vmem:[%s1306_s30 + $0x10] sm:$0xff] %v380_v40  ;;  %798 = vst [vmem:[%s1306_s30 + $0x18] sm:$0xff] %v693_v42 }
 0x108   : > { %1002 = shalt.err (!%p999_p3)
}
 0x109   : > { %s1003_s21 = scalar_lea.hbm %s1327_s7, 768  ;;  %s1007_s24 = scalar_lea.hbm %s1379_s2, 1536 }
 0x10a   : > { %p1004_p4 = scmp.ne.s32.totalorder %s1327_s7, %s1003_s21  ;;  %p1008_p9 = scmp.lt.u32.totalorder %s1327_s7, %s1379_s2 }
 0x10b   : > { %p1009_p10 = scmp.lt.u32.totalorder %s1007_s24, %s1003_s21  ;;  %p1011_p12 = scmp.lt.u32.totalorder %s1003_s21, %s1327_s7 }
 0x10c   : > { %p1005_p7 = pnand %p1004_p4, %p1116_p5 }
 0x10d   : > { %p1010_p11 = por %p1009_p10, %p1008_p9 }
 0x10e   : > { %p1006_p8 = pneg %p1005_p7 }
 0x10f   : > { %p1012_p13 = por %p1011_p12, %p1010_p11 }
 0x111   : > { %p1013_p0 = pnand %p1012_p13, %p1006_p8 }
 0x113   : > { %1016 = shalt.err (!%p1013_p0)
}
 0x114   : > { %s1061_s27 = smov 256   ;;  %s1062_s28 = smov 16  }
 0x115   : > { %927 = dma.vmem_to_hbm [thread:$0]  (%p1116_p5), %s1329_s4, 768, %s1327_s7, %s1336_s8, %s1061_s27, %s1061_s27, %s1062_s28  }
 0x116 PF: > { %p933_p1 = scmp.ge.s32.totalorder %s1051_s12, 2  ;;  %s830_s29 = sand.u32 1, %s1039_s9  }
 0x117   : > { %s831_s30 = scalar_lea.sflag [#allocation3], %s830_s29 }
 0x118   : > { %p930_p2 = pnand %p933_p1, %p1120_p6 }
 0x11a   : > { %1034 = dma.done.wait (!%p930_p2), %s831_s30, 768  }
 0x11b   : > { %1036 = vsyncadd (!%p930_p2), %s831_s30, 4294966528  ;;  %p12_p3 = scmp.ge.s32.totalorder %s1103_s15, 4   ;;  %s1382_s9 = smov %s1043_s10 }
 0x11c   : > { %s1383_s10 = smov %s1047_s11  ;;  %s1384_s11 = smov %s1114_s18 }
 0x11d   : > { %s1385_s12 = smov %s1103_s15  ;;  %14 = sbr.rel (!%p12_p3) target bundleno = 3 (0x3), region = 63 }
 0x124   :  { %836 = vsyncpa [#allocation3], 1 }
 0x125   :  { %838 = vsyncpa [#allocation3 + $0x1], 1 }

</bundles_post_ra>
